<compile_context>
chip_gen: v7x
topology: tpu7x:2x2x1
jax: 0.10.0
libtpu: 0.0.40
codegen_flags: <defaults>
</compile_context>

<pallas_src>
import functools

import jax
import jax.numpy as jnp
from jax.experimental import pallas as pl
from jax.experimental.pallas import tpu as pltpu

_LANES = 512                       # default lane-dense slab width (multiple of 128)
_BLOCK_BYTES = 4 * 1024 * 1024     # ~4 MiB output blocks (double-buffered -> 8 MiB)


def _round_up(x: int, m: int) -> int:
    return (x + m - 1) // m * m


def _lowbias32(x):
    """One lowbias32 avalanche round on uint32 (2 integer multiplies)."""
    x = x ^ (x >> 16)
    x = x * jnp.uint32(0x7FEB352D)
    x = x ^ (x >> 15)
    x = x * jnp.uint32(0x846CA68B)
    x = x ^ (x >> 16)
    return x


def _block_counter(shape, base_u32):
    """Global flat element counter for this block, computed in uint32."""
    rows_i = jax.lax.broadcasted_iota(jnp.int32, shape, 0).astype(jnp.uint32)
    cols_i = jax.lax.broadcasted_iota(jnp.int32, shape, 1).astype(jnp.uint32)
    n = shape[1]
    if n & (n - 1) == 0:                      # power of two -> shift, not multiply
        row_term = rows_i << (n.bit_length() - 1)
    else:
        row_term = rows_i * jnp.uint32(n)
    return base_u32 + row_term + cols_i


def _random_node_kernel(seed_ref, o_ref, *, dist, p):
    rows, lanes = o_ref.shape
    pid_u = pl.program_id(0).astype(jnp.uint32)
    seed_u = seed_ref[0].astype(jnp.uint32)

    if dist == "normal":
        # One hash per output PAIR; hi/lo 16-bit halves become (u1, u2).
        half = lanes // 2
        base = pid_u * jnp.uint32(rows * half)
        ctr = _block_counter((rows, half), base)
        bits = _lowbias32(ctr ^ seed_u ^ jnp.uint32(0x3243F6A9))
        inv16 = jnp.float32(1.0 / 65536.0)
        u1 = ((bits >> 16).astype(jnp.int32).astype(jnp.float32) + 0.5) * inv16
        u2 = ((bits & jnp.uint32(0xFFFF)).astype(jnp.int32).astype(jnp.float32)
              + 0.5) * inv16
        r = jnp.sqrt(-2.0 * jnp.log(u1))
        theta = jnp.float32(2.0 * jnp.pi) * u2
        if half % 128 == 0:
            # Lane-aligned half stores: no concat temporary, no relayout.
            o_ref[:, :half] = (r * jnp.cos(theta)).astype(o_ref.dtype)
            o_ref[:, half:] = (r * jnp.sin(theta)).astype(o_ref.dtype)
        else:
            z = jnp.concatenate([r * jnp.cos(theta), r * jnp.sin(theta)], axis=1)
            o_ref[...] = z.astype(o_ref.dtype)
    elif dist == "uniform":
        base = pid_u * jnp.uint32(rows * lanes)
        ctr = _block_counter((rows, lanes), base)
        bits = _lowbias32(ctr ^ seed_u)
        # Top 24 bits are exactly representable in f32; +0.5 keeps (0, 1) open.
        u = ((bits >> 8).astype(jnp.int32).astype(jnp.float32) + 0.5) \
            * jnp.float32(1.0 / (1 << 24))
        o_ref[...] = u.astype(o_ref.dtype)
    elif dist == "bernoulli":
        base = pid_u * jnp.uint32(rows * lanes)
        ctr = _block_counter((rows, lanes), base)
        bits = _lowbias32(ctr ^ seed_u ^ jnp.uint32(0x85EBCA6B))
        # Threshold raw bits directly: P(bits < p * 2^32) = p.
        # (p == 1.0 clamps to 1 - 2^-32; p == 0.0 is exact.)
        thr = jnp.uint32(min(int(round(p * (1 << 32))), (1 << 32) - 1))
        o_ref[...] = (bits < thr).astype(o_ref.dtype)
    else:
        raise ValueError(f"unknown dist {dist!r}")


def _choose_tiling(n_rows: int, lanes: int, itemsize: int):
    """Pick (padded_rows, tile_rows, grid_len): lane-dense ~4 MiB blocks and an
    even grid of >= 2 steps (so v7x's two TensorCores both get work)."""
    max_tile = max(8, (_BLOCK_BYTES // (lanes * itemsize)) // 8 * 8)
    if n_rows <= 8:
        return n_rows, n_rows, 1
    grid_len = max(2, -(-n_rows // max_tile))
    if grid_len % 2:
        grid_len += 1
    tile_rows = _round_up(-(-n_rows // grid_len), 8)
    return grid_len * tile_rows, tile_rows, grid_len


def random_node_encoder_forward(
    num_nodes: int,
    dim_emb: int,
    seed: int,
    *,
    dist: str = "normal",
    p: float = 0.5,           # Bernoulli probability
    expand_x: bool = False,
    dtype=jnp.float32,
):
    """Pallas equivalent of RandomNodeEncoder.forward: returns the new batch.x."""
    if expand_x:
        # Mirrors the reference module.
        raise NotImplementedError

    itemsize = jnp.dtype(dtype).itemsize

    # Lane-dense slab layout chosen to avoid a wrapper slice-copy when possible.
    if _LANES % dim_emb == 0:                 # dim_emb divides 512 (16/32/64/...)
        lanes = _LANES
        nodes_per_row = _LANES // dim_emb
    elif dim_emb % 128 == 0:                  # already lane-dense, emit directly
        lanes = dim_emb
        nodes_per_row = 1
    else:
        # TODO(synk): dim_emb neither dividing 512 nor a multiple of 128 falls
        # back to a flat slab plus one XLA slice copy in the wrapper.
        lanes = _LANES
        nodes_per_row = 0

    if nodes_per_row:
        padded_nodes = _round_up(num_nodes, 8 * nodes_per_row)
        n_rows = padded_nodes // nodes_per_row
    else:
        total = num_nodes * dim_emb
        n_rows = _round_up(max(-(-total // lanes), 8), 8)

    n_rows, tile_rows, grid_len = _choose_tiling(n_rows, lanes, itemsize)

    kernel = functools.partial(_random_node_kernel, dist=dist, p=p)
    seed_arr = jnp.asarray([seed], dtype=jnp.int32)

    n_elems = n_rows * lanes
    cost = pl.CostEstimate(
        flops=15 * n_elems,                                  # integer hash + transform (VALU)
        transcendentals=(2 * n_elems) if dist == "normal" else 0,
        bytes_accessed=n_elems * itemsize,                   # write-only kernel
    )

    slab = pl.pallas_call(
        kernel,
        out_shape=jax.ShapeDtypeStruct((n_rows, lanes), dtype),
        grid_spec=pltpu.PrefetchScalarGridSpec(
            num_scalar_prefetch=1,            # seed lives in SMEM
            grid=(grid_len,),
            in_specs=[],
            # index_map receives the scalar-prefetch ref as trailing arg.
            out_specs=pl.BlockSpec((tile_rows, lanes), lambda i, seed: (i, 0)),
        ),
        compiler_params=pltpu.CompilerParams(
            # Stateless counter-based PRNG -> tiles are independent; lets the
            # grid shard across both TensorCores on v7x.
            dimension_semantics=("parallel",),
            # v5e's default scoped VMEM is only 16 MiB; 32 MiB is safe on all
            # generations (v7x physical = 64 MiB) and fits 2x4 MiB output
            # buffers plus the normal path's block-sized temporaries.
            vmem_limit_bytes=32 << 20,
        ),
        cost_estimate=cost,
    )(seed_arr)

    if nodes_per_row:
        out = slab.reshape(-1, dim_emb)       # contiguous reshape -> free
        return out if out.shape[0] == num_nodes else out[:num_nodes]
    total = num_nodes * dim_emb
    return slab.reshape(-1)[:total].reshape(num_nodes, dim_emb)


if __name__ == "__main__":
    key = jax.random.PRNGKey(0)

    # Small synthetic "batch": the forward only consumes num_nodes (and device);
    # edge_index / old x are untouched except that x is replaced.
    num_nodes = 256
    dim_emb = 32
    k_edges, k_x = jax.random.split(key)
    edge_index = jax.random.randint(k_edges, (2, 512), 0, num_nodes, dtype=jnp.int32)
    old_x = jax.random.normal(k_x, (num_nodes, 8), dtype=jnp.float32)  # ignored

    new_x = random_node_encoder_forward(num_nodes, dim_emb, seed=0, dist="normal")
    new_x = jax.block_until_ready(new_x)

    assert new_x.shape == (num_nodes, dim_emb)
    assert new_x.dtype == jnp.float32
    assert bool(jnp.all(jnp.isfinite(new_x)))
    # Sanity: roughly standard normal.
    assert abs(float(new_x.mean())) < 0.2
    assert 0.7 < float(new_x.std()) < 1.3

    # Also exercise the other derived encoders (Uniform / Bernoulli).
    ux = jax.block_until_ready(
        random_node_encoder_forward(num_nodes, dim_emb, seed=1, dist="uniform"))
    bx = jax.block_until_ready(
        random_node_encoder_forward(num_nodes, dim_emb, seed=2, dist="bernoulli"))
    assert ux.shape == (num_nodes, dim_emb) and bx.shape == (num_nodes, dim_emb)
    assert bool(jnp.all((ux > 0.0) & (ux < 1.0)))
    assert bool(jnp.all((bx == 0.0) | (bx == 1.0)))
    assert 0.3 < float(bx.mean()) < 0.7

    # Determinism: same seed -> same draw; different seed -> different draw.
    again = jax.block_until_ready(
        random_node_encoder_forward(num_nodes, dim_emb, seed=0, dist="normal"))
    other = jax.block_until_ready(
        random_node_encoder_forward(num_nodes, dim_emb, seed=7, dist="normal"))
    assert bool(jnp.all(new_x == again))
    assert not bool(jnp.all(new_x == other))

    # A larger, multi-tile problem to exercise the >=2-step parallel grid.
    big = jax.block_until_ready(
        random_node_encoder_forward(20000, 64, seed=3, dist="normal"))
    assert big.shape == (20000, 64)
    assert abs(float(big.mean())) < 0.05 and 0.9 < float(big.std()) < 1.1

    print("KERNEL_OK")
</pallas_src>

<mosaic_0001>
module attributes {stable_mosaic.version = 11 : i64} {
  func.func @_random_node_kernel(%arg0: i32, %arg1: memref<1xi32, #tpu.memory_space<smem>>, %arg2: memref<8x512xf32, #tpu.memory_space<vmem>>) attributes {dimension_semantics = [#tpu.dimension_semantics<parallel>], iteration_bounds = array<i64: 2>, scalar_prefetch = 1 : i64, scratch_operands = 0 : i64, tpu.core_type = #tpu.core_type<tc>, window_params = [{transform_indices = @transform_0, window_bounds = array<i64: 8, 512>}]} {
    %c0 = arith.constant 0 : index
    %0 = memref.load %arg1[%c0] : memref<1xi32, #tpu.memory_space<smem>>
    %c2048_i32 = arith.constant 2048 : i32
    %1 = arith.muli %arg0, %c2048_i32 : i32
    %2 = tpu.iota {dimensions = array<i32: 0>} : vector<8x256xi32>
    %3 = tpu.iota {dimensions = array<i32: 1>} : vector<8x256xi32>
    %c8_i32 = arith.constant 8 : i32
    %4 = vector.broadcast %c8_i32 : i32 to vector<8x256xi32>
    %5 = arith.shli %2, %4 : vector<8x256xi32>
    %6 = vector.broadcast %1 : i32 to vector<8x256xi32>
    %7 = arith.addi %6, %5 : vector<8x256xi32>
    %8 = arith.addi %7, %3 : vector<8x256xi32>
    %9 = vector.broadcast %0 : i32 to vector<8x256xi32>
    %10 = arith.xori %8, %9 : vector<8x256xi32>
    %c843314857_i32 = arith.constant 843314857 : i32
    %11 = vector.broadcast %c843314857_i32 : i32 to vector<8x256xi32>
    %12 = arith.xori %10, %11 : vector<8x256xi32>
    %c16_i32 = arith.constant 16 : i32
    %13 = vector.broadcast %c16_i32 : i32 to vector<8x256xi32>
    %14 = arith.shrui %12, %13 : vector<8x256xi32>
    %15 = arith.xori %12, %14 : vector<8x256xi32>
    %c2146121005_i32 = arith.constant 2146121005 : i32
    %16 = vector.broadcast %c2146121005_i32 : i32 to vector<8x256xi32>
    %17 = arith.muli %15, %16 : vector<8x256xi32>
    %c15_i32 = arith.constant 15 : i32
    %18 = vector.broadcast %c15_i32 : i32 to vector<8x256xi32>
    %19 = arith.shrui %17, %18 : vector<8x256xi32>
    %20 = arith.xori %17, %19 : vector<8x256xi32>
    %c-2073254261_i32 = arith.constant -2073254261 : i32
    %21 = vector.broadcast %c-2073254261_i32 : i32 to vector<8x256xi32>
    %22 = arith.muli %20, %21 : vector<8x256xi32>
    %c16_i32_0 = arith.constant 16 : i32
    %23 = vector.broadcast %c16_i32_0 : i32 to vector<8x256xi32>
    %24 = arith.shrui %22, %23 : vector<8x256xi32>
    %25 = arith.xori %22, %24 : vector<8x256xi32>
    %c16_i32_1 = arith.constant 16 : i32
    %26 = vector.broadcast %c16_i32_1 : i32 to vector<8x256xi32>
    %27 = arith.shrui %25, %26 : vector<8x256xi32>
    %28 = arith.sitofp %27 : vector<8x256xi32> to vector<8x256xf32>
    %cst = arith.constant 5.000000e-01 : f32
    %29 = vector.broadcast %cst : f32 to vector<8x256xf32>
    %30 = arith.addf %28, %29 : vector<8x256xf32>
    %cst_2 = arith.constant 1.52587891E-5 : f32
    %31 = vector.broadcast %cst_2 : f32 to vector<8x256xf32>
    %32 = arith.mulf %30, %31 : vector<8x256xf32>
    %c65535_i32 = arith.constant 65535 : i32
    %33 = vector.broadcast %c65535_i32 : i32 to vector<8x256xi32>
    %34 = arith.andi %25, %33 : vector<8x256xi32>
    %35 = arith.sitofp %34 : vector<8x256xi32> to vector<8x256xf32>
    %cst_3 = arith.constant 5.000000e-01 : f32
    %36 = vector.broadcast %cst_3 : f32 to vector<8x256xf32>
    %37 = arith.addf %35, %36 : vector<8x256xf32>
    %cst_4 = arith.constant 1.52587891E-5 : f32
    %38 = vector.broadcast %cst_4 : f32 to vector<8x256xf32>
    %39 = arith.mulf %37, %38 : vector<8x256xf32>
    %40 = math.log %32 : vector<8x256xf32>
    %cst_5 = arith.constant -2.000000e+00 : f32
    %41 = vector.broadcast %cst_5 : f32 to vector<8x256xf32>
    %42 = arith.mulf %41, %40 : vector<8x256xf32>
    %43 = math.sqrt %42 : vector<8x256xf32>
    %cst_6 = arith.constant 6.28318548 : f32
    %44 = vector.broadcast %cst_6 : f32 to vector<8x256xf32>
    %45 = arith.mulf %44, %39 : vector<8x256xf32>
    %46 = math.cos %45 : vector<8x256xf32>
    %47 = arith.mulf %43, %46 : vector<8x256xf32>
    %c0_7 = arith.constant 0 : index
    %c0_8 = arith.constant 0 : index
    %48 = vector.load %arg2[%c0_7, %c0_8] : memref<8x512xf32, #tpu.memory_space<vmem>>, vector<8x256xf32>
    tpu.vector_store %arg2[%c0_7, %c0_8], %47 {strides = array<i32>} : memref<8x512xf32, #tpu.memory_space<vmem>>, vector<8x256xf32>,
    %49 = math.sin %45 : vector<8x256xf32>
    %50 = arith.mulf %43, %49 : vector<8x256xf32>
    %c0_9 = arith.constant 0 : index
    %c256 = arith.constant 256 : index
    %51 = vector.load %arg2[%c0_9, %c256] : memref<8x512xf32, #tpu.memory_space<vmem>>, vector<8x256xf32>
    tpu.vector_store %arg2[%c0_9, %c256], %50 {strides = array<i32>} : memref<8x512xf32, #tpu.memory_space<vmem>>, vector<8x256xf32>,
    return
  }
  func.func @transform_0(%arg0: i32, %arg1: memref<1xi32, #tpu.memory_space<smem>>) -> (i32, i32) {
    %c0_i32 = arith.constant 0 : i32
    %c0_i32_0 = arith.constant 0 : i32
    return %arg0, %c0_i32 : i32, i32
  }
}

</mosaic_0001>

<bundles_post_ra>
// kernel: tpu_custom_call.1
= control target key start
LH: loop header
LB: loop body
LE: loop exit
PB: predicated region body
PF: predicated region fallthrough
CT: control target
= control target key end

     0   :  { %s963_s0 = inlined_call_operand.<no memory space> [shape: s32[1], index: 0, kind: input, shape index: {}]   ;;  %s964_s1 = inlined_call_operand.hbm [shape: f32[16,512], index: 1, kind: output, shape index: {}]  }
   0x1   :  { %6 = sst [smem:[#allocation3]] %s963_s0 }
   0x2   :  { %7 = vsyncpa [#allocation5], 0 }
   0x3   :  { %9 = vsyncpa [#allocation5 + $0x1], 0  ;;  %s763_s8 = smov 0   ;;  %s765_s9 = smov 0  }
   0x4   :  { %s767_s10 = smov 0  }
   0x5 LB: > { %s599_s0 = sadd.s32 4294967295, %s741_s10   ;;  %s780_s11 = sadd.s32 1, %s741_s10   ;;  %s741_s10 = sphi %s767_s10, %s971_s10   ;;  %s737_s9 = sphi %s765_s9, %s970_s9   ;;  %s733_s8 = sphi %s763_s8, %s969_s8  }
   0x6   : > { %s18_s12 = ssub.s32 %s741_s10, %s780_s11  ;;  %s21_s13 = sadd.s32 1, %s737_s9 }
   0x7   : > { %p19_p0 = scmp.eq.s32.totalorder %s18_s12, 0  ;;  %p600_p1 = scmp.ne.s32.totalorder %s18_s12, 0 }
   0x8   : > { %p25_p2 = scmp.eq.s32.totalorder %s741_s10, 1  ;;  %p30_p3 = scmp.ne.s32.totalorder %s737_s9, %s733_s8 }
   0x9   : > { %s789_s14 = scalar_select %p19_p0, %s737_s9, %s21_s13  }
   0xa   : > { %p791_p4 = por %p600_p1, %p25_p2  ;;  %p31_p5 = scmp.eq.s32.totalorder %s599_s0, 1 }
   0xb   : > { %p601_p7 = scmp.ge.s32.totalorder %s741_s10, 2 }
   0xc   : > { %p795_p6 = por %p31_p5, %p30_p3  ;;  %s48_s17 = sld [smem:[#allocation3]] (!%p601_p7)  ;;  %v50_v0 = vlaneseq (!%p601_p7)  ;;  %v743_v56 = vmov (!%p601_p7), 683565275   ;;  %v744_v58 = vmov (!%p601_p7), 2475754826  }
   0xd   : > { %40 = sbr.rel (%p601_p7) target bundleno = 158 (0x9e), region = 12  ;;  %s603_s18 = sshll.u32 (!%p601_p7), %s741_s10, 11  ;;  %v745_v60 = vmov (!%p601_p7), 2131351028  }
   0xe   : > { %v51_v1 = vshrl.u32 (!%p601_p7), %v50_v0, 7  ;;  %v53_v2 = vand.u32 (!%p601_p7), 127, %v50_v0  ;;  %v56_v3 = vstv (!%p601_p7), %s603_s18  ;;  %s45_s19 = sand.u32 (!%p601_p7), 1, %s737_s9   ;;  %s625_s22 = sshll.u32 (!%p601_p7), %s741_s10, 9 }
   0xf   : > { %s602_s20 = sshll.u32 (!%p601_p7), %s45_s19, 5  ;;  %s920_s26 = scalar_lea.hbm (!%p601_p7), %s964_s1, %s625_s22 }
  0x10   : > { %v55_v4 = vshll.u32 (!%p601_p7), %v51_v1, 8  ;;  %v54_v5 = vadd.s32 (!%p601_p7), 128, %v53_v2  ;;  %s905_s21 = scalar_lea.vmem (!%p601_p7), [#allocation4], %s602_s20  ;;  %s542_s27 = scalar_lea.sflag (!%p601_p7), [#allocation5], %s45_s19 }
  0x11   : > { %s556_s23 = sshll.u32 (!%p601_p7), %s905_s21, 4  ;;  %s749_s29 = smov (!%p601_p7), [#allocation4]   ;;  %s922_s23 = int_to_ptr.vmem [resolvable:$true] %s556_s23 }
  0x12   : > { %v57_v6 = vadd.s32 (!%p601_p7), %v56_v3, %v55_v4  ;;  %v60_v7 = vstv (!%p601_p7), %s48_s17  ;;  %s687_s28 = scalar_lea.vmem (!%p601_p7), %s922_s23, 512  ;;  %s691_s30 = sshll.u32 (!%p601_p7), %s749_s29, 4  ;;  %s692_s30 = int_to_ptr.vmem [resolvable:$false] %s691_s30 }
  0x13   : > { %p688_p8 = scmp.ne.s32.totalorder (!%p601_p7), %s922_s23, %s687_s28  ;;  %s693_s2 = scalar_lea.vmem (!%p601_p7), %s692_s30, 1024 }
  0x14   : > { %v58_v8 = vadd.s32 %v57_v6, %v53_v2  ;;  %v59_v9 = vadd.s32 %v57_v6, %v54_v5  ;;  %v746_v5 = vmov 2102212464   ;;  %p694_p11 = scmp.lt.s32.totalorder %s922_s23, %s692_s30  ;;  %p695_p12 = scmp.lt.s32.totalorder %s693_s2, %s687_s28 }
  0x15   : > { %p689_p9 = pnand %p688_p8, %p791_p4 }
  0x16   : > { %v61_v10 = vxor.u32 %v60_v7, %v58_v8  ;;  %v62_v11 = vxor.u32 %v60_v7, %v59_v9  ;;  %v747_v8 = vmov 920167782   ;;  %p696_p13 = por %p695_p12, %p694_p11 }
  0x17   : > { %p690_p10 = pneg %p689_p9 }
  0x18   : > { %v63_v12 = vxor.u32 843314857, %v61_v10  ;;  %v64_v13 = vxor.u32 843314857, %v62_v11  ;;  %v748_v11 = vmov 1326507024  }
  0x19   : > { %p697_p0 = pnand %p696_p13, %p690_p10 }
  0x1a   : > { %v65_v14 = vshrl.u32 %v63_v12, 16  ;;  %v66_v15 = vshrl.u32 %v64_v13, 16 }
  0x1c   : > { %v67_v16 = vxor.u32 %v65_v14, %v63_v12  ;;  %v68_v17 = vxor.u32 %v66_v15, %v64_v13 }
  0x1e   : > { %v69_v18 = vmul.u32 2146121005, %v67_v16  ;;  %v70_v19 = vmul.u32 2146121005, %v68_v17 }
  0x20   : > { %v71_v20 = vshrl.u32 %v69_v18, 15  ;;  %v72_v21 = vshrl.u32 %v70_v19, 15 }
  0x22   : > { %v73_v22 = vxor.u32 %v71_v20, %v69_v18  ;;  %v74_v23 = vxor.u32 %v72_v21, %v70_v19 }
  0x24   : > { %v75_v24 = vmul.u32 2221713035, %v73_v22  ;;  %v76_v25 = vmul.u32 2221713035, %v74_v23 }
  0x26   : > { %v77_v26 = vshrl.u32 %v75_v24, 16  ;;  %v78_v27 = vshrl.u32 %v76_v25, 16 }
  0x28   : > { %v801_v28 = vxor.u32 %v77_v26, %v75_v24  ;;  %v803_v29 = vxor.u32 %v78_v27, %v76_v25 }
  0x2a   : > { %v89_v30 = vand.u32 65535, %v801_v28  ;;  %v90_v31 = vand.u32 65535, %v803_v29  ;;  %v81_v62 = vshrl.u32 %v801_v28, 16 }
  0x2c   : > { %v91_v32 = vcvt.s32.f32 %v89_v30  ;;  %v92_v33 = vcvt.s32.f32 %v90_v31  ;;  %v83_v24 = vcvt.s32.f32 %v81_v62 }
  0x2e   : > { %v93_v34 = vadd.f32 0.5, %v91_v32  ;;  %v94_v35 = vadd.f32 0.5, %v92_v33 }
  0x30   : > { %v95_v36 = vmul.f32 1.5258789e-05, %v93_v34  ;;  %v96_v37 = vmul.f32 1.5258789e-05, %v94_v35 }
  0x32   : > { %v807_v38 = vmul.f32 6.2831855, %v95_v36  ;;  %v809_v39 = vmul.f32 6.2831855, %v96_v37 }
  0x34   : > { %v122_v40 = vand.u32 2139095040, %v807_v38  ;;  %v119_v41 = vand.u32 2147483647, %v807_v38  ;;  %v225_v42 = vand.u32 2139095040, %v809_v39  ;;  %v222_v0 = vand.u32 2147483647, %v809_v39 }
  0x35   : > { %vm121_vm13 = vcmp.lt.s32.totalorder %v807_v38, 0 }
  0x36   : > { %v123_v43 = vshrl.u32 %v122_v40, 23  ;;  %v226_v44 = vshrl.u32 %v225_v42, 23  ;;  %v126_v46 = vand.u32 8388607, %v119_v41  ;;  %v229_v37 = vand.u32 8388607, %v222_v0 }
  0x37   : > { %v85_v42 = vadd.f32 0.5, %v83_v24  ;;  %vm120_vm14 = vcmp.le.f32.partialorder %v119_v41, 0.7853982 }
  0x38   : > { %v604_v45 = vadd.s32 4294967169, %v123_v43  ;;  %v608_v47 = vadd.s32 4294967169, %v226_v44  ;;  %v127_v50 = vor.u32 8388608, %v126_v46 }
  0x3a   : > { %v129_v48 = vadd.s32 1, %v604_v45  ;;  %v232_v49 = vadd.s32 1, %v608_v47  ;;  %v818_v63 = vshll.u32 %v127_v50, 8 }
  0x3c   : > { %vm130_vm0 = vcmp.gt.s32.totalorder %v129_v48, 0  ;;  %vm233_vm1 = vcmp.gt.s32.totalorder %v232_v49, 0 }
  0x3d   : > { %v131_v51 = vsel %vm130_vm0, %v129_v48, 0  ;;  %v234_v53 = vsel %vm233_vm1, %v232_v49, 0  ;;  %vm224_vm1 = vcmp.lt.s32.totalorder %v809_v39, 0 }
  0x3e   : > { %v133_v52 = vand.u32 31, %v131_v51  ;;  %v132_v54 = vshrl.u32 %v131_v51, 5  ;;  %v236_v1 = vand.u32 31, %v234_v53  ;;  %v235_v44 = vshrl.u32 %v234_v53, 5 }
  0x3f   : > { %v230_v51 = vor.u32 8388608, %v229_v37  ;;  %v87_v53 = vmul.f32 1.5258789e-05, %v85_v42 }
  0x40   : > { %v134_v55 = vsub.s32 32, %v133_v52  ;;  %v136_v57 = vshll.u32 %v743_v56, %v133_v52  ;;  %v139_v59 = vshll.u32 %v744_v58, %v133_v52  ;;  %v142_v61 = vshll.u32 %v745_v60, %v133_v52 }
  0x41   : > { %v145_v7 = vshll.u32 %v746_v5, %v133_v52  ;;  %v148_v10 = vshll.u32 %v747_v8, %v133_v52  ;;  %vm151_vm2 = vcmp.lt.s32.totalorder %v132_v54, 1  ;;  %vm152_vm3 = vcmp.lt.s32.totalorder %v132_v54, 2 }
  0x42   : > { %v135_v2 = vshrl.u32 %v743_v56, %v134_v55  ;;  %v137_v3 = vshrl.u32 %v744_v58, %v134_v55  ;;  %v140_v4 = vshrl.u32 %v745_v60, %v134_v55  ;;  %v143_v6 = vshrl.u32 %v746_v5, %v134_v55 }
  0x43   : > { %v146_v9 = vshrl.u32 %v747_v8, %v134_v55  ;;  %v149_v12 = vshrl.u32 %v748_v11, %v134_v55  ;;  %vm153_vm4 = vcmp.lt.s32.totalorder %v132_v54, 3  ;;  %vm154_vm5 = vcmp.lt.s32.totalorder %v132_v54, 4 }
  0x44   : > { %v138_v13 = vor.u32 %v137_v3, %v136_v57  ;;  %v141_v14 = vor.u32 %v140_v4, %v139_v59  ;;  %v144_v15 = vor.u32 %v143_v6, %v142_v61  ;;  %v237_v32 = vsub.s32 32, %v236_v1 }
  0x45   : > { %v147_v16 = vor.u32 %v146_v9, %v145_v7  ;;  %v150_v17 = vor.u32 %v149_v12, %v148_v10  ;;  %v239_v40 = vshll.u32 %v743_v56, %v236_v1  ;;  %v242_v46 = vshll.u32 %v744_v58, %v236_v1 }
  0x46   : > { %v155_v18 = vsel %vm151_vm2, %v135_v2, %v138_v13  ;;  %v159_v19 = vsel %vm151_vm2, %v138_v13, %v141_v14  ;;  %v163_v20 = vsel %vm151_vm2, %v141_v14, %v144_v15  ;;  %v156_v21 = vsel %vm154_vm5, %v144_v15, 2102212464 }
  0x47   : > { %v160_v22 = vsel %vm154_vm5, %v147_v16, 920167782  ;;  %v164_v23 = vsel %vm154_vm5, %v150_v17, 1326507024  ;;  %v157_v25 = vsel %vm153_vm4, %v141_v14, %v156_v21  ;;  %v240_v45 = vshrl.u32 %v744_v58, %v237_v32 }
  0x48   : > { %v161_v26 = vsel %vm153_vm4, %v144_v15, %v160_v22  ;;  %v165_v27 = vsel %vm153_vm4, %v147_v16, %v164_v23  ;;  %v158_v28 = vsel %vm152_vm3, %v155_v18, %v157_v25  ;;  %v243_v47 = vshrl.u32 %v745_v60, %v237_v32 }
  0x49   : > { %v162_v30 = vsel %vm152_vm3, %v159_v19, %v161_v26  ;;  %v166_v31 = vsel %vm152_vm3, %v163_v20, %v165_v27  ;;  %v174_v43 = vmul.u32 %v818_v63, %v158_v28  ;;  %v245_v48 = vshll.u32 %v745_v60, %v236_v1 }
  0x4a   : > { %v823_v33 = vmul.u32.u64.low %v818_v63, %v166_v31  ;;  %v824_v34 = vmul.u32.u64.high %v818_v63, %v166_v31, %v823_v33  ;;  %v827_v35 = vmul.u32.u64.low %v818_v63, %v162_v30  ;;  %v828_v36 = vmul.u32.u64.high %v818_v63, %v162_v30, %v827_v35 }
  0x4b   : > { %v246_v49 = vshrl.u32 %v746_v5, %v237_v32  ;;  %v241_v52 = vor.u32 %v240_v45, %v239_v40  ;;  %v244_v54 = vor.u32 %v243_v47, %v242_v46  ;;  %v248_v59 = vshll.u32 %v746_v5, %v236_v1 }
  0x4c   : > { %vm176_vm6 = vc.u32 %v824_v34, %v827_v35  ;;  %v177_v50 = vadd.s32 1, %v828_v36  ;;  %v249_v61 = vshrl.u32 %v747_v8, %v237_v32  ;;  %v251_v62 = vshll.u32 %v747_v8, %v236_v1 }
  0x4d   : > { %v247_v55 = vor.u32 %v246_v49, %v245_v48  ;;  %v252_v58 = vshrl.u32 %v748_v11, %v237_v32  ;;  %vm254_vm7 = vcmp.lt.s32.totalorder %v235_v44, 1  ;;  %v238_v60 = vshrl.u32 %v743_v56, %v237_v32 }
  0x4e   : > { %v178_v57 = vsel %vm176_vm6, %v177_v50, %v828_v36  ;;  %v250_v2 = vor.u32 %v249_v61, %v248_v59  ;;  %vm256_vm8 = vcmp.lt.s32.totalorder %v235_v44, 3  ;;  %vm257_vm9 = vcmp.lt.s32.totalorder %v235_v44, 4 }
  0x4f   : > { %v179_v63 = vadd.s32 %v178_v57, %v174_v43  ;;  %v253_v4 = vor.u32 %v252_v58, %v251_v62  ;;  %vm255_vm10 = vcmp.lt.s32.totalorder %v235_v44, 2  ;;  %v270_v6 = vshll.u32 %v230_v51, 8 }
  0x50   : > { %v259_v7 = vsel %vm257_vm9, %v247_v55, 2102212464  ;;  %v262_v9 = vsel %vm254_vm7, %v241_v52, %v244_v54  ;;  %v263_v10 = vsel %vm257_vm9, %v250_v2, 920167782  ;;  %v266_v5 = vsel %vm254_vm7, %v244_v54, %v247_v55 }
  0x51   : > { %v180_v3 = vadd.s32 536870912, %v179_v63  ;;  %v264_v8 = vsel %vm256_vm8, %v247_v55, %v263_v10  ;;  %v267_v11 = vsel %vm257_vm9, %v253_v4, 1326507024  ;;  %671 = vlog2.f32 %v87_v53 }
  0x52   : > { %v258_v56 = vsel %vm254_vm7, %v238_v60, %v241_v52  ;;  %v268_v12 = vsel %vm256_vm8, %v250_v2, %v267_v11  ;;  %v260_v14 = vsel %vm256_vm8, %v244_v54, %v259_v7  ;;  %v265_v15 = vsel %vm255_vm10, %v262_v9, %v264_v8 }
  0x53   : > { %v181_v1 = vshrl.u32 %v180_v3, 30  ;;  %v269_v16 = vsel %vm255_vm10, %v266_v5, %v268_v12  ;;  %v82_v17 = vshrl.u32 %v803_v29, 16  ;;  %v261_v21 = vsel %vm255_vm10, %v258_v56, %v260_v14 }
  0x54   : > { %v849_v18 = vmul.u32.u64.low %v270_v6, %v269_v16  ;;  %v850_v19 = vmul.u32.u64.high %v270_v6, %v269_v16, %v849_v18  ;;  %v853_v22 = vmul.u32.u64.low %v270_v6, %v265_v15  ;;  %v854_v23 = vmul.u32.u64.high %v270_v6, %v265_v15, %v853_v22 }
  0x55   : > { %v182_v13 = vshll.u32 %v181_v1, 30  ;;  %v84_v25 = vcvt.s32.f32 %v82_v17  ;;  %v277_v27 = vmul.u32 %v270_v6, %v261_v21  ;;  %v175_v37 = vadd.s32 %v827_v35, %v824_v34 }
  0x56   : > { %vm279_vm11 = vc.u32 %v850_v19, %v853_v22  ;;  %v280_v28 = vadd.s32 1, %v854_v23  ;;  %v205_v62 = vsub.s32 4, %v181_v1  ;;  %v278_v7 = vadd.s32 %v853_v22, %v850_v19 }
  0x57   : > { %v183_v20 = vsub.s32 %v179_v63, %v182_v13  ;;  %v86_v29 = vadd.f32 0.5, %v84_v25  ;;  %vm883_vm3 = vcmp.le.f32.partialorder %v222_v0, 0.7853982  ;;  %vm211_vm10 = vweird.f32 %v807_v38 }
  0x58   : > { %v281_v32 = vsel %vm279_vm11, %v280_v28, %v854_v23  ;;  %v206_v2 = vsel %vm121_vm13, %v205_v62, %v181_v1 }
  0x59   : > { %v185_v24 = vsub.s32 0, %v183_v20  ;;  %v282_v36 = vadd.s32 %v281_v32, %v277_v27  ;;  %v88_v44 = vmul.f32 1.5258789e-05, %v86_v29  ;;  %v208_v10 = vsel %vm120_vm14, 0, %v206_v2 }
  0x5a   : > { %v422_v1 = vadd.s32 3, %v208_v10  ;;  %v212_v19 = vand.u32 3, %v208_v10 }
  0x5b   : > { %v605_v26 = vmin.u32 %v185_v24, %v183_v20  ;;  %v672_v31 = vpop.eup %671  ;;  %v283_v40 = vadd.s32 536870912, %v282_v36  ;;  %673 = vlog2.f32 %v88_v44 }
  0x5c   : > { %v98_v42 = vmul.f32 0.6931472, %v672_v31  ;;  %v423_v22 = vand.u32 3, %v422_v1  ;;  %vm217_vm4 = vcmp.eq.s32.totalorder %v212_v19, 2  ;;  %vm213_vm6 = vcmp.lt.s32.totalorder %v212_v19, 2 }
  0x5d   : > { %v187_v30 = vclz %v605_v26  ;;  %v861_v48 = vshrl.u32 %v283_v40, 30  ;;  %vm214_vm7 = vcmp.eq.s32.totalorder %v212_v19, 0 }
  0x5e   : > { %v864_v52 = vmul.f32 -2.0, %v98_v42  ;;  %vm428_vm5 = vcmp.eq.s32.totalorder %v423_v22, 2  ;;  %vm425_vm8 = vcmp.eq.s32.totalorder %v423_v22, 0  ;;  %vm424_vm9 = vcmp.lt.s32.totalorder %v423_v22, 2 }
  0x5f   : > { %v606_v33 = vadd.s32 4294967294, %v187_v30  ;;  %v285_v51 = vshll.u32 %v861_v48, 30  ;;  %v308_v24 = vsub.s32 4, %v861_v48 }
  0x60   : > { %675 = vrsqrt.f32 %v864_v52  ;;  %vm105_vm0 = vcmp.eq.f32.partialorder %v864_v52, inf  ;;  %vm107_vm2 = vcmp.eq.f32.partialorder %v864_v52, 0.0  ;;  %v108_v25 = vand.u32 2147483648, %v864_v52 }
  0x61   : > { %vm607_vm12 = vcmp.lt.s32.totalorder %v606_v33, 0  ;;  %v286_v34 = vsub.s32 %v282_v36, %v285_v51  ;;  %v309_v0 = vsel %vm224_vm1, %v308_v24, %v861_v48 }
  0x62   : > { %v190_v43 = vsel %vm607_vm12, 0, %v606_v33 }
  0x63   : > { %v191_v45 = vsub.s32 32, %v190_v43  ;;  %v192_v46 = vshll.u32 %v183_v20, %v190_v43  ;;  %v195_v47 = vsub.s32 4294967266, %v190_v43  ;;  %v288_v59 = vsub.s32 0, %v286_v34 }
  0x65   : > { %v193_v49 = vshrl.u32 %v175_v37, %v191_v45  ;;  %v196_v50 = vadd.s32 127, %v195_v47  ;;  %v609_v53 = vmin.u32 %v288_v59, %v286_v34  ;;  %v674_v4 = vpop.eup %673  ;;  %v311_v47 = vsel %vm883_vm3, 0, %v309_v0 }
  0x66   : > { %v100_v12 = vmul.f32 0.6931472, %v674_v4 }
  0x67   : > { %v194_v54 = vor.u32 %v193_v49, %v192_v46  ;;  %v197_v55 = vshll.u32 %v196_v50, 23  ;;  %v290_v58 = vclz %v609_v53 }
  0x68   : > { %v873_v18 = vmul.f32 -2.0, %v100_v12 }
  0x69   : > { %v198_v35 = vor.u32 4788187, %v197_v55  ;;  %v201_v57 = vcvt.s32.f32 %v194_v54  ;;  %v610_v3 = vadd.s32 4294967294, %v290_v58  ;;  %v315_v55 = vand.u32 3, %v311_v47 }
  0x6a   : > { %v676_v13 = vpop.eup %675  ;;  %vm112_vm11 = vcmp.eq.f32.partialorder %v873_v18, inf  ;;  %vm114_vm12 = vcmp.eq.f32.partialorder %v873_v18, 0.0  ;;  %v115_v59 = vand.u32 2147483648, %v873_v18 }
  0x6b   : > { %v199_v61 = vand.u32 2147483647, %v198_v35  ;;  %vm611_vm15 = vcmp.lt.s32.totalorder %v610_v3, 0  ;;  %v104_v17 = vmul.f32 %v676_v13, %v864_v52 }
  0x6c   : > { %v293_v5 = vsel %vm611_vm15, 0, %v610_v3  ;;  %vm317_vm15 = vcmp.eq.s32.totalorder %v315_v55, 0 }
  0x6d   : > { %v202_v63 = vmul.f32 %v201_v57, %v199_v61  ;;  %v294_v8 = vsub.s32 32, %v293_v5  ;;  %v295_v11 = vshll.u32 %v286_v34, %v293_v5  ;;  %v298_v56 = vsub.s32 4294967266, %v293_v5 }
  0x6e   : > { %v106_v28 = vsel %vm105_vm0, %v864_v52, %v104_v17  ;;  %v526_v52 = vadd.s32 3, %v311_v47 }
  0x6f   : > { %v203_v60 = vxor.u32 2147483648, %v202_v63  ;;  %v296_v41 = vshrl.u32 %v278_v7, %v294_v8  ;;  %v299_v14 = vadd.s32 127, %v298_v56  ;;  %v109_v40 = vsel %vm107_vm2, %v108_v25, %v106_v28 }
  0x70   : > { %v527_v34 = vand.u32 3, %v526_v52 }
  0x71   : > { %v204_v6 = vsel %vm121_vm13, %v203_v60, %v202_v63  ;;  %v297_v15 = vor.u32 %v296_v41, %v295_v11  ;;  %v300_v16 = vshll.u32 %v299_v14, 23  ;;  %vm320_vm13 = vcmp.eq.s32.totalorder %v315_v55, 2 }
  0x72   : > { %v207_v9 = vsel %vm120_vm14, %v807_v38, %v204_v6  ;;  %vm532_vm14 = vcmp.eq.s32.totalorder %v527_v34, 2  ;;  %vm529_vm0 = vcmp.eq.s32.totalorder %v527_v34, 0  ;;  %vm528_vm2 = vcmp.lt.s32.totalorder %v527_v34, 2 }
  0x73   : > { %677 = vcosq.f32 %v207_v9  ;;  %v301_v20 = vor.u32 4788187, %v300_v16  ;;  %v304_v21 = vcvt.s32.f32 %v297_v15 }
  0x74   : > { %679 = vsinq.f32 %v207_v9 }
  0x75   : > { %v302_v23 = vand.u32 2147483647, %v301_v20  ;;  %681 = vrsqrt.f32 %v873_v18 }
  0x77   : > { %v305_v30 = vmul.f32 %v304_v21, %v302_v23 }
  0x79   : > { %v306_v33 = vxor.u32 2147483648, %v305_v30 }
  0x7b   : > { %v307_v43 = vsel %vm224_vm1, %v306_v33, %v305_v30  ;;  %vm316_vm1 = vcmp.lt.s32.totalorder %v315_v55, 2 }
  0x7c   : > { %v310_v46 = vsel %vm883_vm3, %v809_v39, %v307_v43  ;;  %vm314_vm3 = vweird.f32 %v809_v39 }
  0x7d   : > { %v678_v27 = vpop.eup %677  ;;  %683 = vcosq.f32 %v310_v46 }
  0x7e   : > { %v680_v31 = vpop.eup %679  ;;  %v218_v29 = vxor.u32 2147483648, %v678_v27  ;;  %685 = vsinq.f32 %v310_v46 }
  0x7f   : > { %v215_v32 = vxor.u32 2147483648, %v680_v31  ;;  %v682_v54 = vpop.eup %681 }
  0x80   : > { %v219_v36 = vsel %vm217_vm4, %v218_v29, %v680_v31  ;;  %v430_v37 = vsel %vm428_vm5, %v218_v29, %v680_v31  ;;  %v111_v35 = vmul.f32 %v682_v54, %v873_v18 }
  0x81   : > { %v216_v42 = vsel %vm214_vm7, %v678_v27, %v215_v32  ;;  %v427_v44 = vsel %vm425_vm8, %v678_v27, %v215_v32 }
  0x82   : > { %v220_v45 = vsel %vm213_vm6, %v216_v42, %v219_v36  ;;  %v431_v38 = vsel %vm424_vm9, %v427_v44, %v430_v37  ;;  %v113_v62 = vsel %vm112_vm11, %v873_v18, %v111_v35 }
  0x83   : > { %v221_v48 = vsel %vm211_vm10, nan, %v220_v45  ;;  %v432_v49 = vsel %vm211_vm10, nan, %v431_v38  ;;  %v116_v2 = vsel %vm114_vm12, %v115_v59, %v113_v62 }
  0x84   : > { %v325_v50 = vmul.f32 %v221_v48, %v109_v40  ;;  %v537_v51 = vmul.f32 %v432_v49, %v109_v40 }
  0x86   : > { %327 = vst [vmem:[%s905_s21] sm:$0xff] %v325_v50  ;;  %539 = vst [vmem:[%s905_s21 + $0x10] sm:$0xff] %v537_v51 }
  0x87   : > { %v684_v57 = vpop.eup %683 }
  0x88   : > { %v686_v61 = vpop.eup %685  ;;  %v321_v53 = vxor.u32 2147483648, %v684_v57 }
  0x89   : > { %v318_v63 = vxor.u32 2147483648, %v686_v61 }
  0x8a   : > { %v322_v58 = vsel %vm320_vm13, %v321_v53, %v686_v61  ;;  %v534_v60 = vsel %vm532_vm14, %v321_v53, %v686_v61 }
  0x8b   : > { %v319_v3 = vsel %vm317_vm15, %v684_v57, %v318_v63  ;;  %v531_v4 = vsel %vm529_vm0, %v684_v57, %v318_v63 }
  0x8c   : > { %v323_v6 = vsel %vm316_vm1, %v319_v3, %v322_v58  ;;  %v535_v7 = vsel %vm528_vm2, %v531_v4, %v534_v60 }
  0x8d   : > { %v324_v9 = vsel %vm314_vm3, nan, %v323_v6  ;;  %v536_v10 = vsel %vm314_vm3, nan, %v535_v7 }
  0x8e   : > { %v326_v5 = vmul.f32 %v324_v9, %v116_v2  ;;  %v538_v8 = vmul.f32 %v536_v10, %v116_v2 }
  0x90   : > { %328 = vst [vmem:[%s905_s21 + $0x8] sm:$0xff] %v326_v5  ;;  %540 = vst [vmem:[%s905_s21 + $0x18] sm:$0xff] %v538_v8 }
  0x91   : > { %700 = shalt.err (!%p697_p0)
}
  0x92   : > { %s701_s3 = scalar_lea.hbm %s920_s26, 512  ;;  %s705_s6 = scalar_lea.hbm %s964_s1, 1024 }
  0x93   : > { %p702_p1 = scmp.ne.s32.totalorder %s920_s26, %s701_s3  ;;  %p706_p5 = scmp.lt.u32.totalorder %s920_s26, %s964_s1 }
  0x94   : > { %p707_p7 = scmp.lt.u32.totalorder %s705_s6, %s701_s3  ;;  %p709_p9 = scmp.lt.u32.totalorder %s701_s3, %s920_s26 }
  0x95   : > { %p703_p2 = pnand %p702_p1, %p791_p4 }
  0x96   : > { %p708_p8 = por %p707_p7, %p706_p5 }
  0x97   : > { %p704_p3 = pneg %p703_p2 }
  0x98   : > { %p710_p10 = por %p709_p9, %p708_p8 }
  0x9a   : > { %p711_p11 = pnand %p710_p10, %p704_p3 }
  0x9c   : > { %714 = shalt.err (!%p711_p11)
}
  0x9d   : > { %634 = dma.vmem_to_hbm [thread:$0]  (%p791_p4), %s922_s23, 512, %s920_s26, %s542_s27  }
  0x9e PF: > { %p640_p12 = scmp.ge.s32.totalorder %s741_s10, 1  ;;  %s568_s12 = sand.u32 1, %s733_s8  }
  0x9f   : > { %s569_s13 = scalar_lea.sflag [#allocation5], %s568_s12 }
  0xa0   : > { %p637_p13 = pnand %p640_p12, %p795_p6 }
  0xa2   : > { %728 = dma.done.wait (!%p637_p13), %s569_s13, 512  }
  0xa3   : > { %730 = vsyncadd (!%p637_p13), %s569_s13, 4294966784  ;;  %p12_p0 = scmp.ge.s32.totalorder %s780_s11, 3   ;;  %s969_s8 = smov %s737_s9 }
  0xa4   : > { %s970_s9 = smov %s789_s14  ;;  %s971_s10 = smov %s780_s11 }
  0xa5   :  { %14 = sbr.rel (!%p12_p0) target bundleno = 5 (0x5), region = 44 }
  0xac   :  { %574 = vsyncpa [#allocation5], 1 }
  0xad   :  { %576 = vsyncpa [#allocation5 + $0x1], 1 }

</bundles_post_ra>
